<compile_context>
chip_gen: v6e
topology: v6e:2x2x1
jax: 0.10.0
libtpu: 0.0.40
codegen_flags: <defaults>
</compile_context>

<pallas_src>
import jax
import jax.numpy as jnp
from jax.experimental import pallas as pl
from jax.experimental.pallas import tpu as pltpu


def _convt_kernel(x_ref, w_ref, b_ref, o_ref):
    """One batch element.

    x_ref: (1, Cin, H*W)        bf16   -- native NCHW slab
    w_ref: (Cout*ks*ks, Cin)    bf16   -- W[ci,co,kh,kw] -> rows (co,kh,kw)
    b_ref: (Cout*ks*ks, 1)      f32    -- bias repeated per (kh,kw)
    o_ref: (1, Cout*ks*ks, H*W) f32    -- lane-dense output block
    """
    o_ref[0] = (
        jnp.dot(w_ref[...], x_ref[0], preferred_element_type=jnp.float32)
        + b_ref[...]
    )


def transposed_upsample(x, weight, bias, *, ks=2):
    """Equivalent of nn.ConvTranspose2d(Cin, Cout, kernel_size=ks, stride=ks)(x).

    x:      (B, Cin, H, W)        float32, NCHW
    weight: (Cin, Cout, ks, ks)   float32 (PyTorch ConvTranspose2d layout)
    bias:   (Cout,)               float32
    returns (B, Cout, ks*H, ks*W) float32
    """
    B, Cin, H, W = x.shape
    Cin_w, Cout, KH, KW = weight.shape
    assert Cin == Cin_w and KH == ks and KW == ks
    HW = H * W
    N = Cout * KH * KW

    # MXU operands in bf16 (accumulation stays f32 inside the kernel).
    x_r = x.reshape(B, Cin, HW).astype(jnp.bfloat16)          # pure reshape
    w2 = (jnp.transpose(weight, (1, 2, 3, 0))                  # (Cout,kh,kw,Cin)
          .reshape(N, Cin).astype(jnp.bfloat16))
    b2 = jnp.repeat(bias.astype(jnp.float32), KH * KW).reshape(N, 1)

    out = pl.pallas_call(
        _convt_kernel,
        out_shape=jax.ShapeDtypeStruct((B, N, HW), jnp.float32),
        grid=(B,),
        in_specs=[
            pl.BlockSpec((1, Cin, HW), lambda b: (b, 0, 0)),
            pl.BlockSpec((N, Cin), lambda b: (0, 0)),   # resident across grid
            pl.BlockSpec((N, 1), lambda b: (0, 0)),     # resident across grid
        ],
        out_specs=pl.BlockSpec((1, N, HW), lambda b: (b, 0, 0)),
        compiler_params=pltpu.CompilerParams(
            dimension_semantics=("parallel",)),
    )(x_r, w2, b2)

    # (B, Cout, kh, kw, H, W) -> (B, Cout, H, kh, W, kw) -> (B, Cout, ks*H, ks*W)
    y = out.reshape(B, Cout, KH, KW, H, W)
    y = jnp.transpose(y, (0, 1, 4, 2, 5, 3))
    return y.reshape(B, Cout, KH * H, KW * W)


if __name__ == "__main__":
    B, CIN, COUT, H, W, KS = 2, 4, 4, 16, 16, 2

    key = jax.random.PRNGKey(0)
    kx, kw, kb = jax.random.split(key, 3)
    x = jax.random.normal(kx, (B, CIN, H, W), jnp.float32)
    bound = 1.0 / (CIN * KS * KS) ** 0.5   # PyTorch-style uniform init bound
    weight = jax.random.uniform(kw, (CIN, COUT, KS, KS), jnp.float32,
                                -bound, bound)
    bias = jax.random.uniform(kb, (COUT,), jnp.float32, -bound, bound)

    fwd = jax.jit(transposed_upsample)
    out = jax.block_until_ready(fwd(x, weight, bias))
    assert out.shape == (B, COUT, KS * H, KS * W), out.shape
    assert bool(jnp.all(jnp.isfinite(out)))

    # Pure-JAX f32 reference of ConvTranspose2d(ks=2, stride=2).
    ref = (jnp.einsum('bchw,coij->bohiwj', x, weight)
           .reshape(B, COUT, KS * H, KS * W)
           + bias[None, :, None, None])
    assert bool(jnp.allclose(out, ref, atol=1e-2, rtol=1e-2)), \
        float(jnp.max(jnp.abs(out - ref)))

    print("KERNEL_OK")
</pallas_src>

<mosaic_0001>
module attributes {stable_mosaic.version = 11 : i64} {
  func.func @_convt_kernel(%arg0: i32, %arg1: memref<1x4x256xbf16, #tpu.memory_space<vmem>>, %arg2: memref<16x4xbf16, #tpu.memory_space<vmem>>, %arg3: memref<16x1xf32, #tpu.memory_space<vmem>>, %arg4: memref<1x16x256xf32, #tpu.memory_space<vmem>>) attributes {dimension_semantics = [#tpu.dimension_semantics<parallel>], iteration_bounds = array<i64: 2>, scalar_prefetch = 0 : i64, scratch_operands = 0 : i64, tpu.core_type = #tpu.core_type<tc>, window_params = [{transform_indices = @transform_0, window_bounds = array<i64: 1, 4, 256>}, {pipeline_mode = #tpu.pipeline_mode<synchronous>, transform_indices = @transform_1, window_bounds = array<i64: 16, 4>}, {pipeline_mode = #tpu.pipeline_mode<synchronous>, transform_indices = @transform_2, window_bounds = array<i64: 16, 1>}, {transform_indices = @transform_3, window_bounds = array<i64: 1, 16, 256>}]} {
    %c0 = arith.constant 0 : index
    %c0_0 = arith.constant 0 : index
    %0 = vector.load %arg2[%c0, %c0_0] : memref<16x4xbf16, #tpu.memory_space<vmem>>, vector<16x4xbf16>
    %c0_1 = arith.constant 0 : index
    %c0_2 = arith.constant 0 : index
    %c0_3 = arith.constant 0 : index
    %1 = vector.load %arg1[%c0_1, %c0_2, %c0_3] : memref<1x4x256xbf16, #tpu.memory_space<vmem>>, vector<1x4x256xbf16>
    %2 = vector.shape_cast %1 : vector<1x4x256xbf16> to vector<4x256xbf16>
    %cst = arith.constant dense<0.000000e+00> : vector<16x256xf32>
    %3 = tpu.matmul %0, %2, %cst {dimension_numbers = #tpu.dot_dimension_numbers<[1], [0], [0], [1], [0, 0, 1, 1], [], []>} : vector<16x4xbf16>, vector<4x256xbf16>, vector<16x256xf32> -> vector<16x256xf32>
    %c0_4 = arith.constant 0 : index
    %c0_5 = arith.constant 0 : index
    %4 = vector.load %arg3[%c0_4, %c0_5] : memref<16x1xf32, #tpu.memory_space<vmem>>, vector<16x1xf32>
    %5 = vector.broadcast %4 : vector<16x1xf32> to vector<16x256xf32>
    %6 = arith.addf %3, %5 : vector<16x256xf32>
    %c0_6 = arith.constant 0 : index
    %c0_7 = arith.constant 0 : index
    %c0_8 = arith.constant 0 : index
    %7 = vector.load %arg4[%c0_6, %c0_7, %c0_8] : memref<1x16x256xf32, #tpu.memory_space<vmem>>, vector<1x16x256xf32>
    %8 = vector.shape_cast %7 : vector<1x16x256xf32> to vector<16x256xf32>
    %9 = vector.shape_cast %6 : vector<16x256xf32> to vector<1x16x256xf32>
    tpu.vector_store %arg4[%c0_6, %c0_7, %c0_8], %9 {strides = array<i32>} : memref<1x16x256xf32, #tpu.memory_space<vmem>>, vector<1x16x256xf32>,
    return
  }
  func.func @transform_0(%arg0: i32) -> (i32, i32, i32) {
    %c0_i32 = arith.constant 0 : i32
    %c0_i32_0 = arith.constant 0 : i32
    %c0_i32_1 = arith.constant 0 : i32
    return %arg0, %c0_i32, %c0_i32_0 : i32, i32, i32
  }
  func.func @transform_1(%arg0: i32) -> (i32, i32) {
    %c0_i32 = arith.constant 0 : i32
    %c0_i32_0 = arith.constant 0 : i32
    %c0_i32_1 = arith.constant 0 : i32
    return %c0_i32, %c0_i32_0 : i32, i32
  }
  func.func @transform_2(%arg0: i32) -> (i32, i32) {
    %c0_i32 = arith.constant 0 : i32
    %c0_i32_0 = arith.constant 0 : i32
    %c0_i32_1 = arith.constant 0 : i32
    return %c0_i32, %c0_i32_0 : i32, i32
  }
  func.func @transform_3(%arg0: i32) -> (i32, i32, i32) {
    %c0_i32 = arith.constant 0 : i32
    %c0_i32_0 = arith.constant 0 : i32
    %c0_i32_1 = arith.constant 0 : i32
    return %arg0, %c0_i32, %c0_i32_0 : i32, i32, i32
  }
}

</mosaic_0001>

<bundles_post_ra>
// kernel: transposed_upsample.1
= control target key start
LH: loop header
LB: loop body
LE: loop exit
PB: predicated region body
PF: predicated region fallthrough
CT: control target
= control target key end

     0   :  { %s371_s12 = smov 0   ;;  %s397_s0 = inlined_call_operand.vmem [shape: bf16[2,4,256], index: 0, kind: input, shape index: {}]   ;;  %s398_s1 = inlined_call_operand.vmem [shape: bf16[16,4], index: 1, kind: input, shape index: {}]   ;;  %s399_s2 = inlined_call_operand.vmem [shape: f32[16,1], index: 2, kind: input, shape index: {}]   ;;  %s400_s3 = inlined_call_operand.vmem [shape: f32[2,16,256], index: 3, kind: output, shape index: {}]  }
   0x1 LB: > { %s314_s13 = sadd.s32 4294967295, %s348_s12   ;;  %p318_p0 = scmp.ge.s32.totalorder %s348_s12, 1  ;;  %s348_s12 = sphi %s371_s12, %s13_s12  }
   0x2   : > { %p137_p1 = scmp.lt.s32.totalorder %s348_s12, 3 }
   0x4   : > { %p138_p2 = pnand %p318_p0, %p137_p1 }
   0x5   : > { %p161_p3 = scmp.lt.s32.totalorder (!%p138_p2), %s314_s13, 1 }
   0x6   : > { %141 = sbr.rel (%p138_p2) target bundleno = 223 (0xdf), region = 32 }
   0xb   : > { %v350_v0 = vmov 0   ;;  %v175_v1 = vld [vmem:[%s399_s2] sm:$0xff]  ;;  %s402_s13 = smov (!%p161_p3, %s314_s13), 1  ;;  %v176_v2 = vld [vmem:[%s399_s2 + $0x8] sm:$0xff]  ;;  %vm205_vm0 = vcmask 1041408   ;;  %vm201_vm1 = vcmask 31744  }
   0xc   : > { %244 = vmatprep.mubr.bf16.mxu0 %v350_v0  ;;  %340 = vset.pattern.permute.xlu0 %v350_v0  ;;  %s329_s18 = sshll.u32 %s402_s13, 2  ;;  %v341_v6 = vld [vmem:[%s398_s1] sm:$0xff]   ;;  %s330_s24 = sshll.u32 %s402_s13, 5 }
   0xd   : > { %179 = vperm.xlu0 %340, %v175_v1   ;;  %s165_s21 = scalar_lea.vmem %s397_s0, %s329_s18  ;;  %s170_s27 = scalar_lea.vmem %s400_s3, %s330_s24 }
   0xe   : > { %v324_v3 = vld.sshfl [vmem:[%s165_s21] sm:$0x33 pattern:$0x76325410] }
   0xf   : > { %v200_v4 = vcombine.high %v324_v3, %v324_v3  ;;  %v207_v5 = vsel %vm205_vm0, %v324_v3, 0 }
  0x11   : > { %184 = vperm.xlu0 %340, %v176_v2   ;;  %325 = vmatprep.subr.msk.bf16.mxu0 %vm205_vm0, %v200_v4 }
  0x12   : > { %227 = vmatpush1.bf16.msra.mxu0 %v207_v5 }
  0x15   : > { %326 = vmatmul.mubr.msk.bf16.vlgmr.msra.gmra.mxu0 %vm201_vm1, %v341_v6 }
  0x88   : > { %v180_v7 = vpop.permute.xlu0 %179 }
  0x8c   : > { %v185_v12 = vpop.permute.xlu0 %184 }
  0xd5   : > { %v246_v8 = vpop.f32.mrf.mxu0 }
  0xd6   : > { %v247_v9 = vadd.f32 %v246_v8, %v180_v7 }
  0xd7   : > { %v248_v10 = vpop.f32.mrf.mxu0 }
  0xd8   : > { %255 = vst [vmem:[%s170_s27] sm:$0xff] %v247_v9  ;;  %v249_v11 = vadd.f32 %v248_v10, %v180_v7 }
  0xd9   : > { %v250_v13 = vpop.f32.mrf.mxu0 }
  0xda   : > { %256 = vst [vmem:[%s170_s27 + $0x8] sm:$0xff] %v249_v11  ;;  %v251_v14 = vadd.f32 %v250_v13, %v185_v12 }
  0xdb   : > { %v252_v15 = vpop.f32.mrf.mxu0 }
  0xdc   : > { %257 = vst [vmem:[%s170_s27 + $0x10] sm:$0xff] %v251_v14  ;;  %v253_v16 = vadd.f32 %v252_v15, %v185_v12 }
  0xde   : > { %258 = vst [vmem:[%s170_s27 + $0x18] sm:$0xff] %v253_v16 }
  0xdf PF: > { %s13_s12 = sadd.s32 1, %s348_s12  }
  0xe0   : > { %p10_p4 = scmp.ge.s32.totalorder %s13_s12, 4  }
  0xe2   :  { %12 = sbr.rel (!%p10_p4) target bundleno = 1 (0x1), region = 62 }

</bundles_post_ra>
